<compile_context>
chip_gen: v7x
topology: tpu7x:2x2x1
jax: 0.10.0
libtpu: 0.0.40
codegen_flags: <defaults>
</compile_context>

<pallas_src>
import jax
import jax.numpy as jnp
from jax.experimental import pallas as pl
from jax.experimental.pallas import tpu as pltpu


def _regression_kernel(wT_ref, b_ref, x_ref, mask_ref, tgt_ref, o_ref):
    # wT_ref:   (H, R)   fc1 weight^T, VMEM-resident across grid steps
    # b_ref:    (1, R)   fc1 bias, VMEM-resident
    # x_ref:    (tn, H)  activation rows for this tile
    # mask_ref: (tn, R)
    # tgt_ref:  (tn, R)
    # o_ref:    (tn, R)
    y = jnp.dot(x_ref[...], wT_ref[...], preferred_element_type=jnp.float32)
    o_ref[...] = (y + b_ref[...]) * mask_ref[...] + tgt_ref[...]


def _pick_row_tile(bp, max_tile=4096):
    """Pick a row-tile size over the flattened B*P axis.

    - bp > max_tile:    fixed fat tile (multiple of 8); Pallas masks the
                        ragged last block automatically.
    - medium bp:        split into 2 steps so a megacore/2-TC part can
                        shard the "parallel" grid axis.
    - small bp:         one block equal to the full extent (always a legal
                        TPU block shape regardless of alignment).
    """
    if bp > max_tile:
        return max_tile                      # multiple of 8
    if bp >= 1024 and bp % 16 == 0:
        return bp // 2                       # 2 steps, each a multiple of 8
    return bp                                # full-extent single block


def unfixed_regression_net_forward(input_attn_hidden_traces,
                                   target_hidden_traces,
                                   target_traces,
                                   regression_mask,
                                   fc1_weight,
                                   fc1_bias):
    """Pallas implementation of UnfixedRegressionNet.forward.

    input_attn_hidden_traces: (B, P, H) float32
    target_hidden_traces:     unused (kept for signature parity)
    target_traces:            (B, P, R) float32
    regression_mask:          (B, P, R) float32
    fc1_weight:               (R, H)    float32  (PyTorch Linear layout)
    fc1_bias:                 (R,)      float32
    returns:                  (B, P, R) float32
    """
    del target_hidden_traces  # not used by the reference forward
    B, P, H = input_attn_hidden_traces.shape
    R = fc1_weight.shape[0]
    BP = B * P

    # Zero-copy natural-layout 2-D views; no transpose, no pad.
    x2 = input_attn_hidden_traces.reshape(BP, H).astype(jnp.float32)
    mask2 = regression_mask.reshape(BP, R).astype(jnp.float32)
    tgt2 = target_traces.reshape(BP, R).astype(jnp.float32)
    wT = fc1_weight.astype(jnp.float32).T          # (H, R), transposed once
    b = fc1_bias.reshape(1, R).astype(jnp.float32)

    tn = _pick_row_tile(BP)
    grid = (pl.cdiv(BP, tn),)

    cost = pl.CostEstimate(
        flops=2 * BP * H * R,
        transcendentals=0,
        bytes_accessed=4 * (BP * (H + 3 * R) + H * R + R),
    )

    out2 = pl.pallas_call(
        _regression_kernel,
        out_shape=jax.ShapeDtypeStruct((BP, R), jnp.float32),
        grid=grid,
        in_specs=[
            pl.BlockSpec((H, R), lambda i: (0, 0)),     # weight^T: resident
            pl.BlockSpec((1, R), lambda i: (0, 0)),     # bias:     resident
            pl.BlockSpec((tn, H), lambda i: (i, 0)),    # x tile
            pl.BlockSpec((tn, R), lambda i: (i, 0)),    # mask tile
            pl.BlockSpec((tn, R), lambda i: (i, 0)),    # target tile
        ],
        out_specs=pl.BlockSpec((tn, R), lambda i: (i, 0)),
        input_output_aliases={4: 0},                    # target -> output
        compiler_params=pltpu.CompilerParams(
            dimension_semantics=("parallel",),
            vmem_limit_bytes=32 * 1024 * 1024),
        cost_estimate=cost,
    )(wT, b, x2, mask2, tgt2)

    return out2.reshape(B, P, R)


def _reference_forward(x, target_traces, regression_mask, w, b):
    # Pure-JAX reference mirroring the PyTorch forward exactly.
    y = jnp.einsum("bph,rh->bpr", x, w) + b
    return y * regression_mask + target_traces


if __name__ == "__main__":
    # Small shapes consistent with the module.
    batch_size = 2
    pedestrian_num = 4
    hidden_size = 32
    regression_size = 8
    # fc2/fc3 (hidden1_size=32, hidden2_size=64) are unused in forward.

    key = jax.random.PRNGKey(0)
    k_x, k_tgt_h, k_tgt, k_mask, k_w, k_b = jax.random.split(key, 6)

    x = jax.random.normal(k_x, (batch_size, pedestrian_num, hidden_size),
                          dtype=jnp.float32)
    target_hidden_traces = jax.random.normal(
        k_tgt_h, (batch_size, pedestrian_num, hidden_size), dtype=jnp.float32)
    target_traces = jax.random.normal(
        k_tgt, (batch_size, pedestrian_num, regression_size),
        dtype=jnp.float32)
    regression_mask = (jax.random.uniform(
        k_mask, (batch_size, pedestrian_num, regression_size)) > 0.5
        ).astype(jnp.float32)

    # Deterministic fc1 parameter init (PyTorch Linear-style uniform bound).
    bound = 1.0 / jnp.sqrt(jnp.float32(hidden_size))
    fc1_weight = jax.random.uniform(
        k_w, (regression_size, hidden_size), minval=-bound, maxval=bound,
        dtype=jnp.float32)
    fc1_bias = jax.random.uniform(
        k_b, (regression_size,), minval=-bound, maxval=bound,
        dtype=jnp.float32)

    out = unfixed_regression_net_forward(
        x, target_hidden_traces, target_traces, regression_mask,
        fc1_weight, fc1_bias)
    out = jax.block_until_ready(out)

    ref = _reference_forward(x, target_traces, regression_mask,
                             fc1_weight, fc1_bias)
    assert out.shape == (batch_size, pedestrian_num, regression_size)
    assert jnp.allclose(out, ref, atol=1e-5, rtol=1e-5)

    print("KERNEL_OK")
</pallas_src>

<mosaic_0001>
module attributes {stable_mosaic.version = 11 : i64} {
  func.func @_regression_kernel(%arg0: i32, %arg1: memref<32x8xf32, #tpu.memory_space<vmem>>, %arg2: memref<1x8xf32, #tpu.memory_space<vmem>>, %arg3: memref<8x32xf32, #tpu.memory_space<vmem>>, %arg4: memref<8x8xf32, #tpu.memory_space<vmem>>, %arg5: memref<8x8xf32, #tpu.memory_space<vmem>>, %arg6: memref<8x8xf32, #tpu.memory_space<vmem>>) attributes {dimension_semantics = [#tpu.dimension_semantics<parallel>], iteration_bounds = array<i64: 1>, scalar_prefetch = 0 : i64, scratch_operands = 0 : i64, tpu.core_type = #tpu.core_type<tc>, window_params = [{pipeline_mode = #tpu.pipeline_mode<synchronous>, transform_indices = @transform_0, window_bounds = array<i64: 32, 8>}, {pipeline_mode = #tpu.pipeline_mode<synchronous>, transform_indices = @transform_1, window_bounds = array<i64: 1, 8>}, {transform_indices = @transform_2, window_bounds = array<i64: 8, 32>}, {transform_indices = @transform_3, window_bounds = array<i64: 8, 8>}, {transform_indices = @transform_4, window_bounds = array<i64: 8, 8>}, {transform_indices = @transform_5, window_bounds = array<i64: 8, 8>}]} {
    %c0 = arith.constant 0 : index
    %c0_0 = arith.constant 0 : index
    %0 = vector.load %arg3[%c0, %c0_0] : memref<8x32xf32, #tpu.memory_space<vmem>>, vector<8x32xf32>
    %c0_1 = arith.constant 0 : index
    %c0_2 = arith.constant 0 : index
    %1 = vector.load %arg1[%c0_1, %c0_2] : memref<32x8xf32, #tpu.memory_space<vmem>>, vector<32x8xf32>
    %cst = arith.constant dense<0.000000e+00> : vector<8x8xf32>
    %2 = tpu.matmul %0, %1, %cst {dimension_numbers = #tpu.dot_dimension_numbers<[1], [0], [0], [1], [0, 0, 1, 1], [], []>} : vector<8x32xf32>, vector<32x8xf32>, vector<8x8xf32> -> vector<8x8xf32>
    %c0_3 = arith.constant 0 : index
    %c0_4 = arith.constant 0 : index
    %3 = vector.load %arg2[%c0_3, %c0_4] : memref<1x8xf32, #tpu.memory_space<vmem>>, vector<1x8xf32>
    %4 = vector.broadcast %3 : vector<1x8xf32> to vector<8x8xf32>
    %5 = arith.addf %2, %4 : vector<8x8xf32>
    %c0_5 = arith.constant 0 : index
    %c0_6 = arith.constant 0 : index
    %6 = vector.load %arg4[%c0_5, %c0_6] : memref<8x8xf32, #tpu.memory_space<vmem>>, vector<8x8xf32>
    %7 = arith.mulf %5, %6 : vector<8x8xf32>
    %c0_7 = arith.constant 0 : index
    %c0_8 = arith.constant 0 : index
    %8 = vector.load %arg5[%c0_7, %c0_8] : memref<8x8xf32, #tpu.memory_space<vmem>>, vector<8x8xf32>
    %9 = arith.addf %7, %8 : vector<8x8xf32>
    %c0_9 = arith.constant 0 : index
    %c0_10 = arith.constant 0 : index
    %10 = vector.load %arg6[%c0_9, %c0_10] : memref<8x8xf32, #tpu.memory_space<vmem>>, vector<8x8xf32>
    tpu.vector_store %arg6[%c0_9, %c0_10], %9 {strides = array<i32>} : memref<8x8xf32, #tpu.memory_space<vmem>>, vector<8x8xf32>,
    return
  }
  func.func @transform_0(%arg0: i32) -> (i32, i32) {
    %c0_i32 = arith.constant 0 : i32
    %c0_i32_0 = arith.constant 0 : i32
    %c0_i32_1 = arith.constant 0 : i32
    return %c0_i32, %c0_i32_0 : i32, i32
  }
  func.func @transform_1(%arg0: i32) -> (i32, i32) {
    %c0_i32 = arith.constant 0 : i32
    %c0_i32_0 = arith.constant 0 : i32
    %c0_i32_1 = arith.constant 0 : i32
    return %c0_i32, %c0_i32_0 : i32, i32
  }
  func.func @transform_2(%arg0: i32) -> (i32, i32) {
    %c0_i32 = arith.constant 0 : i32
    %c0_i32_0 = arith.constant 0 : i32
    return %arg0, %c0_i32 : i32, i32
  }
  func.func @transform_3(%arg0: i32) -> (i32, i32) {
    %c0_i32 = arith.constant 0 : i32
    %c0_i32_0 = arith.constant 0 : i32
    return %arg0, %c0_i32 : i32, i32
  }
  func.func @transform_4(%arg0: i32) -> (i32, i32) {
    %c0_i32 = arith.constant 0 : i32
    %c0_i32_0 = arith.constant 0 : i32
    return %arg0, %c0_i32 : i32, i32
  }
  func.func @transform_5(%arg0: i32) -> (i32, i32) {
    %c0_i32 = arith.constant 0 : i32
    %c0_i32_0 = arith.constant 0 : i32
    return %arg0, %c0_i32 : i32, i32
  }
}

</mosaic_0001>

<bundles_post_ra>
// kernel: tpu_custom_call.1
= control target key start
LH: loop header
LB: loop body
LE: loop exit
PB: predicated region body
PF: predicated region fallthrough
CT: control target
= control target key end

     0   :  { %10 = vsyncpa [#allocation3], 0  ;;  %s297_s0 = inlined_call_operand.vmem [shape: f32[32,8], index: 0, kind: input, shape index: {}]   ;;  %s298_s1 = inlined_call_operand.vmem [shape: f32[1,8], index: 1, kind: input, shape index: {}]   ;;  %s299_s2 = inlined_call_operand.vmem [shape: f32[8,32], index: 2, kind: input, shape index: {}]   ;;  %s300_s3 = inlined_call_operand.vmem [shape: f32[8,8], index: 3, kind: input, shape index: {}]   ;;  %s301_s4 = inlined_call_operand.hbm [shape: f32[8,8], index: 4, kind: input, shape index: {}, may-alias: {4,5}]   ;;  %s302_s5 = inlined_call_operand.hbm [shape: f32[8,8], index: 5, kind: output, shape index: {}, may-alias: {4,5}]  }
   0x1   :  { %11 = vsyncpa [#allocation4], 0  ;;  %s217_s18 = smov [#allocation2]   ;;  %s169_s22 = scalar_lea.hbm %s301_s4, 128 }
   0x2   :  { %s26_s19 = sshll.u32 %s217_s18, 4  ;;  %p170_p0 = scmp.ne.s32.totalorder %s301_s4, %s169_s22  ;;  %s27_s19 = int_to_ptr.vmem [resolvable:$true] %s26_s19 }
   0x3   :  { %p173_p1 = scmp.lt.u32.totalorder %s169_s22, %s301_s4 }
   0x5   :  { %p175_p2 = pnand %p173_p1, %p170_p0 }
   0x7   :  { %178 = shalt.err (!%p175_p2)
}
   0x8   :  { %s179_s27 = scalar_lea.vmem %s27_s19, 128  ;;  %p184_p4 = scmp.lt.s32.totalorder %s27_s19, %s27_s19 }
   0x9   :  { %p180_p3 = scmp.ne.s32.totalorder %s27_s19, %s179_s27  ;;  %p185_p5 = scmp.lt.s32.totalorder %s179_s27, %s179_s27 }
   0xb   :  { %p186_p6 = por %p185_p5, %p184_p4 }
   0xd   :  { %p187_p7 = pnand %p186_p6, %p180_p3 }
   0xf   :  { %190 = shalt.err (!%p187_p7)
}
  0x10   :  { %29 = dma.hbm_to_vmem [thread:$0]  %s301_s4, 128, %s27_s19, [#allocation3]  }
  0x11   :  { %213 = dma.done.wait [#allocation3], 128  }
  0x12   :  { %214 = vsyncadd [#allocation3], 4294967168  ;;  %v218_v0 = vmov 0.0|0.0   ;;  %vm219_vm0 = vmmov 0   ;;  %v220_v1 = vmov 0.0   ;;  %v34_v2 = vld [vmem:[%s297_s0] sm:$0xff] }
  0x13   :  { %158 = vmatprep.subr.bf16.mxu0 %v218_v0  ;;  %155 = vmatprep.mubr.msk.f32.mxu0 %vm219_vm0, %v220_v1  ;;  %v35_v3 = vld [vmem:[%s297_s0 + $0x8] sm:$0xff]  ;;  %v36_v4 = vld [vmem:[%s297_s0 + $0x10] sm:$0xff]  ;;  %v37_v6 = vld [vmem:[%s297_s0 + $0x18] sm:$0xff]  ;;  %vm45_vm1 = vcmask 261120   ;;  %s221_s0 = smov [#allocation5]   ;;  %vm123_vm2 = vcmask 64512  }
  0x14   :  { %v159_v5 = vpack.c.bf16 %v35_v3, %v34_v2  ;;  %v162_v7 = vpack.c.bf16 %v37_v6, %v36_v4  ;;  %v33_v8 = vld [vmem:[%s299_s2] sm:$0xff]  ;;  %s131_s18 = sshll.u32 %s221_s0, 4  ;;  %s132_s18 = int_to_ptr.vmem [resolvable:$true] %s131_s18 }
  0x15   :  { %v140_v9 = vld [vmem:[%s298_s1] ss:$0 sm:$0xff]  ;;  %s191_s2 = scalar_lea.vmem %s132_s18, 128  ;;  %p196_p9 = scmp.lt.s32.totalorder %s132_s18, %s132_s18 }
  0x16   :  { %160 = vmatpush3.bf16.msra.mxu0 %v159_v5  ;;  %v119_v11 = vld [vmem:[%s300_s3] sm:$0xff]  ;;  %p192_p8 = scmp.ne.s32.totalorder %s132_s18, %s191_s2  ;;  %p197_p10 = scmp.lt.s32.totalorder %s191_s2, %s191_s2 }
  0x17   :  { %161 = vmatprep.subr.bf16.mxu0 %v218_v0  ;;  %v121_v14 = vld [vmem:[#allocation2] sm:$0xff] }
  0x18   :  { %p198_p11 = por %p197_p10, %p196_p9 }
  0x1a   :  { %163 = vmatpush3.bf16.msra.mxu0 %v162_v7  ;;  %p199_p12 = pnand %p198_p11, %p192_p8 }
  0x1d   :  { %156 = vmatmul.mubr.msk.f32.vlgmr.msra.gmra.mrb[0].mxu0 %vm45_vm1, %v33_v8 }
  0xf0   :  { %v115_v10 = vpop.f32.mrb[0].mxu0 }
  0xf1   :  { %v116_v12 = vadd.f32 %v140_v9, %v115_v10  ;;  %v157_v13 = vpop.f32.mrb[1].mxu0 }
  0xf3   :  { %v120_v15 = vmul.f32 %v119_v11, %v116_v12 }
  0xf5   :  { %v122_v16 = vadd.f32 %v121_v14, %v120_v15 }
  0xf7   :  { %124 = vst.msk [vmem:[#allocation5] sm:$0xff] %vm123_vm2, %v122_v16 }
  0xf8   :  { %202 = shalt.err (!%p199_p12)
}
  0xf9   :  { %s203_s3 = scalar_lea.hbm %s302_s5, 128 }
  0xfa   :  { %p204_p13 = scmp.ne.s32.totalorder %s302_s5, %s203_s3  ;;  %p207_p0 = scmp.lt.u32.totalorder %s203_s3, %s302_s5 }
  0xfc   :  { %p209_p1 = pnand %p207_p0, %p204_p13 }
  0xfe   :  { %212 = shalt.err (!%p209_p1)
}
  0xff   :  { %134 = dma.vmem_to_hbm [thread:$0]  %s132_s18, 128, %s302_s5, [#allocation4]  }
 0x100   :  { %215 = dma.done.wait [#allocation4], 128  }
 0x101   :  { %216 = vsyncadd [#allocation4], 4294967168 }
 0x102   :  { %138 = vsyncpa [#allocation3], 1 }
 0x103   :  { %139 = vsyncpa [#allocation4], 1 }

</bundles_post_ra>
